<compile_context>
chip_gen: v5e
topology: v5e:2x2
jax: 0.10.0
libtpu: 0.0.40
codegen_flags: <defaults>
</compile_context>

<pallas_src>
import functools

import jax
import jax.numpy as jnp
from jax.experimental import pallas as pl
from jax.experimental.pallas import tpu as pltpu


def emitter_kernel(xt_ref, w1_ref, b1_ref, w2_ref, b2_ref, w3_ref, b3_ref,
                   o_ref):
    # xt_ref: (input_dim, TILE_B) bf16    -- batch on lanes
    # w*_ref: (out, in) bf16,  b1/b2: (hidden, 1) f32,  b3: (1, 1) f32 in SMEM
    xt = xt_ref[...]

    # Layer 1: (hidden, in) @ (in, TILE_B) -> (hidden, TILE_B), f32 accumulate.
    h1 = jnp.dot(w1_ref[...], xt, preferred_element_type=jnp.float32)
    h1 = jnp.maximum(h1 + b1_ref[...], 0.0)

    # Layer 2: (hidden, hidden) @ (hidden, TILE_B) -> (hidden, TILE_B).
    h2 = jnp.dot(w2_ref[...], h1.astype(w2_ref.dtype),
                 preferred_element_type=jnp.float32)
    h2 = jnp.maximum(h2 + b2_ref[...], 0.0)

    # Layer 3: (1, hidden) @ (hidden, TILE_B) -> (1, TILE_B)  (lane-dense out).
    out = jnp.dot(w3_ref[...], h2.astype(w3_ref.dtype),
                  preferred_element_type=jnp.float32)
    o_ref[...] = (out + b3_ref[0, 0]).astype(o_ref.dtype)


@functools.partial(jax.jit, static_argnames=("tile_b",))
def emitter_forward(x, params, tile_b=128):
    """x: (B, input_dim) float32. Returns (B, 1) float32."""
    w1, b1, w2, b2, w3, b3 = params   # weights stored (out_features, in_features)
    B, input_dim = x.shape
    hidden = w1.shape[0]

    num_tiles = pl.cdiv(B, tile_b)
    b_pad = num_tiles * tile_b

    # Transpose so batch is on lanes; pad batch to a multiple of TILE_B;
    # cast MXU operands to bf16 (accumulation stays f32 inside the kernel).
    xt = jnp.pad(x.T.astype(jnp.bfloat16), ((0, 0), (0, b_pad - B)))
    w1c = w1.astype(jnp.bfloat16)
    w2c = w2.astype(jnp.bfloat16)
    w3c = w3.astype(jnp.bfloat16)

    out_t = pl.pallas_call(
        emitter_kernel,
        out_shape=jax.ShapeDtypeStruct((1, b_pad), jnp.float32),
        grid=(num_tiles,),
        in_specs=[
            # x^T: streamed / double-buffered batch tiles.
            pl.BlockSpec((input_dim, tile_b), lambda i: (0, i)),
            # Weights & vector biases: resident across the whole grid.
            pl.BlockSpec((hidden, input_dim), lambda i: (0, 0)),
            pl.BlockSpec((hidden, 1), lambda i: (0, 0)),
            pl.BlockSpec((hidden, hidden), lambda i: (0, 0)),
            pl.BlockSpec((hidden, 1), lambda i: (0, 0)),
            pl.BlockSpec((1, hidden), lambda i: (0, 0)),
            # Scalar bias in SMEM (no padded VMEM tile / DMA descriptor).
            pl.BlockSpec(memory_space=pltpu.MemorySpace.SMEM),
        ],
        out_specs=pl.BlockSpec((1, tile_b), lambda i: (0, i)),
        compiler_params=pltpu.CompilerParams(
            dimension_semantics=("parallel",)),
    )(xt, w1c, b1, w2c, b2, w3c, b3)

    return out_t[:, :B].T  # (B, 1)


def init_params(key, input_dim, hidden_dim):
    """Matches nn.Linear init U(-1/sqrt(fan_in), 1/sqrt(fan_in)).

    Weights are stored (out_features, in_features); biases as column vectors
    (out_features, 1) so they broadcast along the lane (batch) axis.
    """
    ks = jax.random.split(key, 6)

    def linear(kw, kb, fan_in, fan_out):
        bound = 1.0 / jnp.sqrt(jnp.float32(fan_in))
        w = jax.random.uniform(kw, (fan_out, fan_in), jnp.float32, -bound, bound)
        b = jax.random.uniform(kb, (fan_out, 1), jnp.float32, -bound, bound)
        return w, b

    w1, b1 = linear(ks[0], ks[1], input_dim, hidden_dim)
    w2, b2 = linear(ks[2], ks[3], hidden_dim, hidden_dim)
    w3, b3 = linear(ks[4], ks[5], hidden_dim, 1)
    return (w1, b1, w2, b2, w3, b3)


def reference_forward(x, params):
    """Pure-JAX f32 reference matching the PyTorch module."""
    w1, b1, w2, b2, w3, b3 = params
    h1 = jnp.maximum(x @ w1.T + b1.T, 0.0)
    h2 = jnp.maximum(h1 @ w2.T + b2.T, 0.0)
    return h2 @ w3.T + b3.T


if __name__ == "__main__":
    # Small test shapes consistent with the module; batch=200 exercises both
    # the grid (2 tiles of 128) and the tail-padding path.
    batch, input_dim, hidden_dim = 200, 16, 32

    key = jax.random.PRNGKey(0)
    k_x, k_p = jax.random.split(key)
    x = jax.random.normal(k_x, (batch, input_dim), jnp.float32)
    params = init_params(k_p, input_dim, hidden_dim)

    out = emitter_forward(x, params)
    out = jax.block_until_ready(out)

    ref = reference_forward(x, params)
    assert out.shape == (batch, 1), out.shape
    # bf16 MXU operands (f32 accumulation) -> relaxed tolerance vs f32 reference.
    assert jnp.allclose(out, ref, atol=3e-2, rtol=3e-2), "mismatch vs reference"

    print("KERNEL_OK")
</pallas_src>

<mosaic_0001>
module attributes {stable_mosaic.version = 11 : i64} {
  func.func @emitter_kernel(%arg0: i32, %arg1: memref<16x128xbf16, #tpu.memory_space<vmem>>, %arg2: memref<32x16xbf16, #tpu.memory_space<vmem>>, %arg3: memref<32x1xf32, #tpu.memory_space<vmem>>, %arg4: memref<32x32xbf16, #tpu.memory_space<vmem>>, %arg5: memref<32x1xf32, #tpu.memory_space<vmem>>, %arg6: memref<1x32xbf16, #tpu.memory_space<vmem>>, %arg7: memref<1x1xf32, #tpu.memory_space<smem>>, %arg8: memref<1x128xf32, #tpu.memory_space<vmem>>) attributes {dimension_semantics = [#tpu.dimension_semantics<parallel>], iteration_bounds = array<i64: 2>, scalar_prefetch = 0 : i64, scratch_operands = 0 : i64, tpu.core_type = #tpu.core_type<tc>, window_params = [{transform_indices = @transform_0, window_bounds = array<i64: 16, 128>}, {pipeline_mode = #tpu.pipeline_mode<synchronous>, transform_indices = @transform_1, window_bounds = array<i64: 32, 16>}, {pipeline_mode = #tpu.pipeline_mode<synchronous>, transform_indices = @transform_2, window_bounds = array<i64: 32, 1>}, {pipeline_mode = #tpu.pipeline_mode<synchronous>, transform_indices = @transform_3, window_bounds = array<i64: 32, 32>}, {pipeline_mode = #tpu.pipeline_mode<synchronous>, transform_indices = @transform_4, window_bounds = array<i64: 32, 1>}, {pipeline_mode = #tpu.pipeline_mode<synchronous>, transform_indices = @transform_5, window_bounds = array<i64: 1, 32>}, {transform_indices = @transform_6, window_bounds = array<i64: 1, 1>}, {transform_indices = @transform_7, window_bounds = array<i64: 1, 128>}]} {
    %c0 = arith.constant 0 : index
    %c0_0 = arith.constant 0 : index
    %0 = vector.load %arg1[%c0, %c0_0] : memref<16x128xbf16, #tpu.memory_space<vmem>>, vector<16x128xbf16>
    %c0_1 = arith.constant 0 : index
    %c0_2 = arith.constant 0 : index
    %1 = vector.load %arg2[%c0_1, %c0_2] : memref<32x16xbf16, #tpu.memory_space<vmem>>, vector<32x16xbf16>
    %cst = arith.constant dense<0.000000e+00> : vector<32x128xf32>
    %2 = tpu.matmul %1, %0, %cst {dimension_numbers = #tpu.dot_dimension_numbers<[1], [0], [0], [1], [0, 0, 1, 1], [], []>} : vector<32x16xbf16>, vector<16x128xbf16>, vector<32x128xf32> -> vector<32x128xf32>
    %c0_3 = arith.constant 0 : index
    %c0_4 = arith.constant 0 : index
    %3 = vector.load %arg3[%c0_3, %c0_4] : memref<32x1xf32, #tpu.memory_space<vmem>>, vector<32x1xf32>
    %4 = vector.broadcast %3 : vector<32x1xf32> to vector<32x128xf32>
    %5 = arith.addf %2, %4 : vector<32x128xf32>
    %cst_5 = arith.constant 0.000000e+00 : f32
    %6 = vector.broadcast %cst_5 : f32 to vector<32x128xf32>
    %7 = arith.maximumf %5, %6 : vector<32x128xf32>
    %c0_6 = arith.constant 0 : index
    %c0_7 = arith.constant 0 : index
    %8 = vector.load %arg4[%c0_6, %c0_7] : memref<32x32xbf16, #tpu.memory_space<vmem>>, vector<32x32xbf16>
    %9 = arith.truncf %7 : vector<32x128xf32> to vector<32x128xbf16>
    %cst_8 = arith.constant dense<0.000000e+00> : vector<32x128xf32>
    %10 = tpu.matmul %8, %9, %cst_8 {dimension_numbers = #tpu.dot_dimension_numbers<[1], [0], [0], [1], [0, 0, 1, 1], [], []>} : vector<32x32xbf16>, vector<32x128xbf16>, vector<32x128xf32> -> vector<32x128xf32>
    %c0_9 = arith.constant 0 : index
    %c0_10 = arith.constant 0 : index
    %11 = vector.load %arg5[%c0_9, %c0_10] : memref<32x1xf32, #tpu.memory_space<vmem>>, vector<32x1xf32>
    %12 = vector.broadcast %11 : vector<32x1xf32> to vector<32x128xf32>
    %13 = arith.addf %10, %12 : vector<32x128xf32>
    %cst_11 = arith.constant 0.000000e+00 : f32
    %14 = vector.broadcast %cst_11 : f32 to vector<32x128xf32>
    %15 = arith.maximumf %13, %14 : vector<32x128xf32>
    %c0_12 = arith.constant 0 : index
    %c0_13 = arith.constant 0 : index
    %16 = vector.load %arg6[%c0_12, %c0_13] : memref<1x32xbf16, #tpu.memory_space<vmem>>, vector<1x32xbf16>
    %17 = arith.truncf %15 : vector<32x128xf32> to vector<32x128xbf16>
    %cst_14 = arith.constant dense<0.000000e+00> : vector<1x128xf32>
    %18 = tpu.matmul %16, %17, %cst_14 {dimension_numbers = #tpu.dot_dimension_numbers<[1], [0], [0], [1], [0, 0, 1, 1], [], []>} : vector<1x32xbf16>, vector<32x128xbf16>, vector<1x128xf32> -> vector<1x128xf32>
    %c0_15 = arith.constant 0 : index
    %c0_16 = arith.constant 0 : index
    %19 = memref.load %arg7[%c0_15, %c0_16] : memref<1x1xf32, #tpu.memory_space<smem>>
    %20 = vector.broadcast %19 : f32 to vector<1x128xf32>
    %21 = arith.addf %18, %20 : vector<1x128xf32>
    %c0_17 = arith.constant 0 : index
    %c0_18 = arith.constant 0 : index
    %22 = vector.load %arg8[%c0_17, %c0_18] : memref<1x128xf32, #tpu.memory_space<vmem>>, vector<1x128xf32>
    tpu.vector_store %arg8[%c0_17, %c0_18], %21 {strides = array<i32>} : memref<1x128xf32, #tpu.memory_space<vmem>>, vector<1x128xf32>,
    return
  }
  func.func @transform_0(%arg0: i32) -> (i32, i32) {
    %c0_i32 = arith.constant 0 : i32
    %c0_i32_0 = arith.constant 0 : i32
    return %c0_i32, %arg0 : i32, i32
  }
  func.func @transform_1(%arg0: i32) -> (i32, i32) {
    %c0_i32 = arith.constant 0 : i32
    %c0_i32_0 = arith.constant 0 : i32
    %c0_i32_1 = arith.constant 0 : i32
    return %c0_i32, %c0_i32_0 : i32, i32
  }
  func.func @transform_2(%arg0: i32) -> (i32, i32) {
    %c0_i32 = arith.constant 0 : i32
    %c0_i32_0 = arith.constant 0 : i32
    %c0_i32_1 = arith.constant 0 : i32
    return %c0_i32, %c0_i32_0 : i32, i32
  }
  func.func @transform_3(%arg0: i32) -> (i32, i32) {
    %c0_i32 = arith.constant 0 : i32
    %c0_i32_0 = arith.constant 0 : i32
    %c0_i32_1 = arith.constant 0 : i32
    return %c0_i32, %c0_i32_0 : i32, i32
  }
  func.func @transform_4(%arg0: i32) -> (i32, i32) {
    %c0_i32 = arith.constant 0 : i32
    %c0_i32_0 = arith.constant 0 : i32
    %c0_i32_1 = arith.constant 0 : i32
    return %c0_i32, %c0_i32_0 : i32, i32
  }
  func.func @transform_5(%arg0: i32) -> (i32, i32) {
    %c0_i32 = arith.constant 0 : i32
    %c0_i32_0 = arith.constant 0 : i32
    %c0_i32_1 = arith.constant 0 : i32
    return %c0_i32, %c0_i32_0 : i32, i32
  }
  func.func @transform_6(%arg0: i32) -> (i32, i32) {
    %c0_i32 = arith.constant 0 : i32
    %c0_i32_0 = arith.constant 0 : i32
    %c0_i32_1 = arith.constant 0 : i32
    return %c0_i32, %c0_i32_0 : i32, i32
  }
  func.func @transform_7(%arg0: i32) -> (i32, i32) {
    %c0_i32 = arith.constant 0 : i32
    %c0_i32_0 = arith.constant 0 : i32
    return %c0_i32, %arg0 : i32, i32
  }
}

</mosaic_0001>

<bundles_post_ra>
// kernel: emitter_forward.1
= control target key start
LH: loop header
LB: loop body
LE: loop exit
PB: predicated region body
PF: predicated region fallthrough
CT: control target
= control target key end

     0   :  { %s779_s0 = inlined_call_operand.vmem [shape: bf16[16,256], index: 0, kind: input, shape index: {}]   ;;  %s780_s1 = inlined_call_operand.vmem [shape: bf16[32,16], index: 1, kind: input, shape index: {}]   ;;  %s781_s2 = inlined_call_operand.vmem [shape: f32[32,1], index: 2, kind: input, shape index: {}]   ;;  %s782_s3 = inlined_call_operand.vmem [shape: bf16[32,32], index: 3, kind: input, shape index: {}]   ;;  %s783_s4 = inlined_call_operand.vmem [shape: f32[32,1], index: 4, kind: input, shape index: {}]   ;;  %s784_s5 = inlined_call_operand.vmem [shape: bf16[1,32], index: 5, kind: input, shape index: {}]   ;;  %s785_s6 = inlined_call_operand.<no memory space> [shape: f32[1,1], index: 6, kind: input, shape index: {}]   ;;  %s786_s7 = inlined_call_operand.vmem [shape: f32[1,256], index: 7, kind: output, shape index: {}]  }
   0x1   :  { %12 = sst [smem:[#allocation2]] %s785_s6 }
   0x2   :  { %s683_s26 = smov 0   ;;  %s685_s27 = smov 0  }
   0x3   :  { %s687_s28 = smov 0  }
   0x4 LB: > { %s545_s6 = sadd.s32 4294967295, %s637_s28   ;;  %s700_s29 = sadd.s32 1, %s637_s28   ;;  %s637_s28 = sphi %s687_s28, %s789_s28   ;;  %s633_s27 = sphi %s685_s27, %s788_s27   ;;  %s629_s26 = sphi %s683_s26, %s787_s26  }
   0x5   : > { %s22_s30 = ssub.s32 %s637_s28, %s700_s29  ;;  %s25_s8 = sadd.s32 1, %s633_s27 }
   0x6   : > { %p23_p0 = scmp.eq.s32.totalorder %s22_s30, 0  ;;  %p32_p1 = scmp.ne.s32.totalorder %s633_s27, %s629_s26 }
   0x7   : > { %p33_p2 = scmp.eq.s32.totalorder %s637_s28, 0  ;;  %p548_p4 = scmp.ge.s32.totalorder %s637_s28, 2 }
   0x8   : > { %s709_s9 = scalar_select %p23_p0, %s633_s27, %s25_s8  }
   0x9   : > { %p34_p3 = por %p33_p2, %p32_p1  ;;  %228 = sbr.rel (%p548_p4) target bundleno = 20 (0x14), region = 40 }
   0xe   : > { %231 = sbr.rel (!%p34_p3) target bundleno = 20 (0x14), region = 44  ;;  %s233_s10 = sand.u32 (%p34_p3), 1, %s633_s27  }
   0xf   : > { %s550_s11 = sshll.u32 (%p34_p3), %s637_s28, 2  ;;  %s549_s12 = sshll.u32 (%p34_p3), %s233_s10, 3 }
  0x10   : > { %s237_s15 = scalar_lea.vmem (%p34_p3), %s779_s0, %s550_s11  ;;  %s235_s16 = scalar_lea.vmem (%p34_p3), [#allocation3], %s549_s12 }
  0x11   : > { %v254_v0 = vld [vmem:[%s237_s15] sm:$0xf] (%p34_p3)  ;;  %v256_v1 = vld [vmem:[%s237_s15 + $0x8] sm:$0xf] (%p34_p3) }
  0x12   : > { %255 = vst [vmem:[%s235_s16] sm:$0xf] (%p34_p3), %v254_v0 }
  0x13   : > { %257 = vst [vmem:[%s235_s16 + $0x4] sm:$0xf] %v256_v1 }
  0x14 PF: > { %p551_p5 = scmp.ge.s32.totalorder %s637_s28, 1  ;;  %p284_p6 = scmp.lt.s32.totalorder %s637_s28, 3 }
  0x16   : > { %p285_p7 = pnand %p551_p5, %p284_p6 }
  0x17   : > { %s291_s17 = sand.u32 (!%p285_p7), 1, %s629_s26   ;;  %s473_s30 = sld [smem:[#allocation2]] (!%p285_p7) }
  0x18   : > { %288 = sbr.rel (%p285_p7) target bundleno = 491 (0x1eb), region = 85  ;;  %s552_s22 = sshll.u32 (!%p285_p7), %s291_s17, 3 }
  0x19   : > { %s293_s23 = scalar_lea.vmem (!%p285_p7), [#allocation3], %s552_s22  ;;  %p320_p8 = scmp.lt.s32.totalorder (!%p285_p7), %s545_s6, 1 }
  0x1d   : > { %v332_v2 = vld [vmem:[%s781_s2 + $0x10] sm:$0xff]  ;;  %v330_v3 = vld [vmem:[%s781_s2] sm:$0xff]  ;;  %v639_v4 = vmov 0   ;;  %vm370_vm0 = vcmask 130048   ;;  %v333_v7 = vld [vmem:[%s781_s2 + $0x18] sm:$0xff]  ;;  %vm440_vm1 = vcmask 261120   ;;  %v474_v53 = vstv %s473_s30 }
  0x1e   : > { %613 = vset.pattern.permute.xlu1 %v639_v4  ;;  %612 = vset.pattern.permute.xlu0 %v639_v4  ;;  %v580_v5 = vld [vmem:[%s293_s23] sm:$0xff]  ;;  %v408_v13 = vld [vmem:[%s783_s4 + $0x10] sm:$0xff]  ;;  %v409_v16 = vld [vmem:[%s783_s4 + $0x18] sm:$0xff]  ;;  %s791_s6 = smov (!%p320_p8, %s545_s6), 1 }
  0x1f   : > { %346 = vperm.xlu0 %612, %v332_v2   ;;  %336 = vperm.xlu1 %613, %v330_v3   ;;  %v581_v6 = vld [vmem:[%s780_s1] sm:$0xff]  ;;  %v331_v8 = vld [vmem:[%s781_s2 + $0x8] sm:$0xff]  ;;  %s322_s11 = scalar_lea.vmem %s786_s7, %s791_s6 }
  0x20   : > { %614 = vset.pattern.permute.xlu2 %v639_v4  ;;  %384 = vmatpush.bf16.msra.mxu0 %v580_v5  ;;  %v406_v9 = vld [vmem:[%s783_s4] sm:$0xff]  ;;  %v407_v10 = vld [vmem:[%s783_s4 + $0x8] sm:$0xff] }
  0x21   : > { %v582_v11 = vld [vmem:[%s780_s1 + $0x8] sm:$0xff]  ;;  %422 = vperm.xlu2 %614, %v408_v13   ;;  %v583_v32 = vld [vmem:[%s782_s3] sm:$0xff] }
  0x22   : > { %v584_v33 = vld [vmem:[%s782_s3 + $0x8] sm:$0xff]  ;;  %v470_v52 = vld [vmem:[%s784_s5] sm:$0x1] }
  0x23   : > { %565 = vmatmul.msk.bf16.vlgmr.msra.gmra.mxu0 %vm370_vm0, %v581_v6 }
  0x27   : > { %351 = vperm.xlu0 %612, %v333_v7   ;;  %341 = vperm.xlu1 %613, %v331_v8  }
  0x29   : > { %427 = vperm.xlu2 %614, %v409_v16  }
  0x2f   : > { %412 = vperm.xlu0 %612, %v406_v9   ;;  %417 = vperm.xlu1 %613, %v407_v10  }
  0x33   : > { %566 = vmatmul.msk.bf16.gmra.mxu0 %vm370_vm0, %v582_v11 }
  0x7b   : > { %v423_v35 = vpop.permute.xlu2 %422 }
  0x83   : > { %v428_v40 = vpop.permute.xlu2 %427 }
  0x91   : > { %v337_v15 = vpop.permute.xlu1 %336  ;;  %v347_v17 = vpop.permute.xlu0 %346 }
  0x99   : > { %v342_v19 = vpop.permute.xlu1 %341  ;;  %v352_v21 = vpop.permute.xlu0 %351 }
  0xa0   : > { %v386_v12 = vpop.f32.mrf.mxu0 }
  0xa1   : > { %v387_v25 = vadd.f32 %v386_v12, %v337_v15  ;;  %v418_v38 = vpop.permute.xlu1 %417  ;;  %v413_v44 = vpop.permute.xlu0 %412 }
  0xa3   : > { %v396_v30 = vmax.f32 %v387_v25, 0.0 }
  0xa8   : > { %v388_v14 = vpop.f32.mrf.mxu0 }
  0xa9   : > { %v389_v23 = vadd.f32 %v388_v14, %v342_v19 }
  0xab   : > { %v397_v28 = vmax.f32 %v389_v23, 0.0 }
  0xad   : > { %v404_v31 = vpack.c.bf16 %v397_v28, %v396_v30 }
  0xb0   : > { %v391_v18 = vpop.f32.mrf.mxu0 }
  0xb1   : > { %v392_v20 = vadd.f32 %v391_v18, %v347_v17 }
  0xb3   : > { %v398_v26 = vmax.f32 %v392_v20, 0.0 }
  0xb8   : > { %v393_v22 = vpop.f32.mrf.mxu0 }
  0xb9   : > { %v394_v24 = vadd.f32 %v393_v22, %v352_v21 }
  0xbb   : > { %v399_v27 = vmax.f32 %v394_v24, 0.0 }
  0xbd   : > { %v405_v29 = vpack.c.bf16 %v399_v27, %v398_v26 }
  0xbf   : > { %453 = vmatpush.bf16.msra.mxu1 %v405_v29  ;;  %585 = vmatpush.bf16.msra.mxu3 %v405_v29 }
  0xc3   : > { %454 = vmatpush.bf16.msra.mxu1 %v404_v31  ;;  %586 = vmatpush.bf16.msra.mxu3 %v404_v31 }
  0xc6   : > { %575 = vmatmul.msk.bf16.vlgmr.msra.gmra.mxu1 %vm440_vm1, %v583_v32  ;;  %576 = vmatmul.msk.bf16.vlgmr.msra.gmra.mxu3 %vm440_vm1, %v584_v33 }
 0x143   : > { %v456_v34 = vpop.f32.mrf.mxu1 }
 0x144   : > { %v457_v45 = vadd.f32 %v456_v34, %v413_v44 }
 0x146   : > { %v466_v50 = vmax.f32 %v457_v45, 0.0 }
 0x149   : > { %v461_v36 = vpop.f32.mrf.mxu3 }
 0x14a   : > { %v462_v39 = vadd.f32 %v461_v36, %v423_v35 }
 0x14b   : > { %v458_v37 = vpop.f32.mrf.mxu1 }
 0x14c   : > { %v459_v42 = vadd.f32 %v458_v37, %v418_v38  ;;  %v468_v46 = vmax.f32 %v462_v39, 0.0 }
 0x14e   : > { %v467_v48 = vmax.f32 %v459_v42, 0.0 }
 0x150   : > { %v471_v51 = vpack.c.bf16 %v467_v48, %v466_v50 }
 0x151   : > { %v463_v41 = vpop.f32.mrf.mxu3 }
 0x152   : > { %v464_v43 = vadd.f32 %v463_v41, %v428_v40 }
 0x154   : > { %v469_v47 = vmax.f32 %v464_v43, 0.0 }
 0x156   : > { %v472_v49 = vpack.c.bf16 %v469_v47, %v468_v46 }
 0x158   : > { %484 = vmatpush.bf16.msra.mxu2 %v472_v49 }
 0x15c   : > { %485 = vmatpush.bf16.msra.mxu2 %v471_v51 }
 0x15f   : > { %577 = vmatmul.msk.bf16.vlgmr.msra.gmra.mxu2 %vm440_vm1, %v470_v52 }
 0x1e2   : > { %v487_v54 = vpop.f32.mrf.mxu2 }
 0x1e3   : > { %v488_v55 = vadd.f32 %v487_v54, %v474_v53 }
 0x1e5   : > { %491 = vst [vmem:[%s322_s11] sm:$0x1] %v488_v55 }
 0x1ea   : > { %v489_v56 = vpop.f32.mrf.mxu2 }
 0x1eb PF: > { %p15_p9 = scmp.ge.s32.totalorder %s700_s29, 4   ;;  %s787_s26 = smov %s633_s27 }
 0x1ec   : > { %s788_s27 = smov %s709_s9  ;;  %s789_s28 = smov %s700_s29 }
 0x1ed   :  { %17 = sbr.rel (!%p15_p9) target bundleno = 4 (0x4), region = 124 }

</bundles_post_ra>
